<compile_context>
chip_gen: v6e
topology: v6e:2x2x1
jax: 0.10.0
libtpu: 0.0.40
codegen_flags: <defaults>
</compile_context>

<pallas_src>
import math
import functools

import jax
import jax.numpy as jnp
from jax import lax
from jax.experimental import pallas as pl
from jax.experimental.pallas import tpu as pltpu


# ----------------------------------------------------------------------------
# Tile-size helper: largest quantum-aligned divisor of `dim` that is <= target.
# ----------------------------------------------------------------------------
def _pick_tile(dim, target, quantum):
    if dim <= target:
        return dim
    t = (target // quantum) * quantum
    while t >= quantum:
        if dim % t == 0:
            return t
        t -= quantum
    # TODO(synk): masked ragged-edge tiles; fall back to a single full block.
    return dim


# ----------------------------------------------------------------------------
# Tiled linear kernel: y = x @ W + b
#   grid = (M/tm, N/tn, K/tk), f32 accumulator in VMEM, bias added once on the
#   final K step (no per-iteration bias re-broadcast).
# ----------------------------------------------------------------------------
def _linear_kernel(x_ref, w_ref, b_ref, o_ref, acc_ref):
    k = pl.program_id(2)

    @pl.when(k == 0)
    def _():
        acc_ref[...] = jnp.zeros_like(acc_ref)

    acc_ref[...] += jnp.dot(
        x_ref[...], w_ref[...], preferred_element_type=jnp.float32
    )

    @pl.when(k == pl.num_programs(2) - 1)
    def _():
        o_ref[...] = (acc_ref[...] + b_ref[...].astype(jnp.float32)).astype(o_ref.dtype)


def pallas_linear(x2d, w, b, *, tm_target=256, tn_target=512, tk_target=512):
    """x2d: [M, Din], w: [Din, Dout], b: [Dout] -> [M, Dout]."""
    M, Din = x2d.shape
    Dout = w.shape[1]

    tm = _pick_tile(M, tm_target, 8)
    tn = _pick_tile(Dout, tn_target, 128)
    tk = _pick_tile(Din, tk_target, 128)

    b2d = b.reshape(1, Dout)
    grid = (M // tm, Dout // tn, Din // tk)

    return pl.pallas_call(
        _linear_kernel,
        out_shape=jax.ShapeDtypeStruct((M, Dout), x2d.dtype),
        grid=grid,
        in_specs=[
            pl.BlockSpec((tm, tk), lambda i, j, k: (i, k)),
            pl.BlockSpec((tk, tn), lambda i, j, k: (k, j)),
            pl.BlockSpec((1, tn), lambda i, j, k: (0, j)),
        ],
        out_specs=pl.BlockSpec((tm, tn), lambda i, j, k: (i, j)),
        scratch_shapes=[pltpu.VMEM((tm, tn), jnp.float32)],
        compiler_params=pltpu.CompilerParams(
            dimension_semantics=("parallel", "parallel", "arbitrary")
        ),
    )(x2d, w, b2d)


# ----------------------------------------------------------------------------
# Multi-head attention kernel.
#   Inputs stay in [B, S, D] / [B, Skv, 2D] layout (lane-dense, no transposes).
#   Grid = (B, Sq/tq); each step loads a (tq, d_embed) Q slab plus the full
#   (Skv, 2*d_embed) KV slab (fetched once per batch), loops over heads
#   in-register, and writes one lane-dense (tq, d_embed) output block.
# ----------------------------------------------------------------------------
def _mha_kernel(q_ref, kv_ref, o_ref, *, n_heads, d_head, scale):
    # Fold the 1/sqrt(d_head) scale into Q once (tq*d_embed muls) instead of
    # scaling every (tq, Skv) score matrix.
    q = q_ref[0].astype(jnp.float32) * scale     # (tq, d_embed)
    kv = kv_ref[0]                               # (Skv, 2*d_embed)
    d_embed = n_heads * d_head

    head_outs = []
    for h in range(n_heads):
        lo = h * d_head
        q_h = q[:, lo:lo + d_head]                       # (tq, Dh)
        k_h = kv[:, lo:lo + d_head]                      # (Skv, Dh)
        v_h = kv[:, d_embed + lo:d_embed + lo + d_head]  # (Skv, Dh)

        # scores: contract over d_head without materializing k_h.T
        s = lax.dot_general(
            q_h, k_h, (((1,), (1,)), ((), ())),
            preferred_element_type=jnp.float32,
        )                                                # (tq, Skv)

        m = jnp.max(s, axis=-1, keepdims=True)
        p = jnp.exp(s - m)
        l = jnp.sum(p, axis=-1, keepdims=True)
        o_h = jnp.dot(p.astype(v_h.dtype), v_h, preferred_element_type=jnp.float32)
        o_h = o_h * pl.reciprocal(l, approx=False)       # recip+mul, not divide
        head_outs.append(o_h.astype(o_ref.dtype))

    # single lane-dense store: heads folded back into d_embed on the lane axis
    o_ref[0] = jnp.concatenate(head_outs, axis=-1)


def pallas_mha(q, kv, n_heads, *, tq_target=256):
    """q: [B, Sq, d_embed], kv: [B, Skv, 2*d_embed] -> [B, Sq, d_embed]."""
    B, Sq, d_embed = q.shape
    _, Skv, two_d = kv.shape
    d_head = d_embed // n_heads
    scale = 1.0 / math.sqrt(d_head)

    tq = _pick_tile(Sq, tq_target, 8)
    kernel = functools.partial(
        _mha_kernel, n_heads=n_heads, d_head=d_head, scale=scale
    )

    return pl.pallas_call(
        kernel,
        out_shape=jax.ShapeDtypeStruct((B, Sq, d_embed), q.dtype),
        grid=(B, Sq // tq),
        in_specs=[
            pl.BlockSpec((1, tq, d_embed), lambda b, i: (b, i, 0)),
            pl.BlockSpec((1, Skv, two_d), lambda b, i: (b, 0, 0)),
        ],
        out_specs=pl.BlockSpec((1, tq, d_embed), lambda b, i: (b, i, 0)),
        compiler_params=pltpu.CompilerParams(
            dimension_semantics=("parallel", "parallel")
        ),
    )(q, kv)


# ----------------------------------------------------------------------------
# CrossAttention forward (glue in plain JAX, all heavy math in Pallas)
# ----------------------------------------------------------------------------
def cross_attention_forward(params, query, keys_n_values, n_heads):
    B, Sq, d_embed = query.shape
    _, Skv, d_cross = keys_n_values.shape
    assert d_embed % n_heads == 0, "d_embed must be divisible by n_heads"

    # projections ([B*S, D] views are free reshapes)
    q = pallas_linear(query.reshape(B * Sq, d_embed),
                      params["wq"], params["bq"]).reshape(B, Sq, d_embed)
    kv = pallas_linear(keys_n_values.reshape(B * Skv, d_cross),
                       params["wkv"], params["bkv"]).reshape(B, Skv, 2 * d_embed)

    # attention: head split/merge + K/V split handled inside the kernel,
    # no transposes or wrapper-level slicing copies.
    o = pallas_mha(q, kv, n_heads)                      # [B, Sq, d_embed]

    out = pallas_linear(o.reshape(B * Sq, d_embed),
                        params["wo"], params["bo"]).reshape(B, Sq, d_embed)
    return out


# ----------------------------------------------------------------------------
# Pure-JAX reference (for sanity check)
# ----------------------------------------------------------------------------
def cross_attention_ref(params, query, keys_n_values, n_heads):
    B, Sq, d_embed = query.shape
    _, Skv, _ = keys_n_values.shape
    d_head = d_embed // n_heads
    q = query @ params["wq"] + params["bq"]
    kv = keys_n_values @ params["wkv"] + params["bkv"]
    k, v = kv[..., :d_embed], kv[..., d_embed:]
    qh = q.reshape(B, Sq, n_heads, d_head).transpose(0, 2, 1, 3)
    kh = k.reshape(B, Skv, n_heads, d_head).transpose(0, 2, 1, 3)
    vh = v.reshape(B, Skv, n_heads, d_head).transpose(0, 2, 1, 3)
    s = jnp.einsum("bhqd,bhkd->bhqk", qh, kh) / math.sqrt(d_head)
    p = jax.nn.softmax(s, axis=-1)
    oh = jnp.einsum("bhqk,bhkd->bhqd", p, vh)
    o = oh.transpose(0, 2, 1, 3).reshape(B, Sq, d_embed)
    return o @ params["wo"] + params["bo"]


if __name__ == "__main__":
    # Small shapes consistent with the module
    n_heads = 4
    d_embed = 32
    d_cross = 24
    B, Sq, Skv = 2, 8, 8

    key = jax.random.PRNGKey(0)
    ks = jax.random.split(key, 8)

    # Deterministic parameter init (synthetic; shapes from the module __init__).
    # Weights stored as [d_in, d_out] (transpose of torch nn.Linear .weight).
    def init_w(k, din, dout):
        bound = 1.0 / math.sqrt(din)
        return jax.random.uniform(k, (din, dout), jnp.float32, -bound, bound)

    params = {
        "wq": init_w(ks[0], d_embed, d_embed),
        "bq": jax.random.uniform(ks[1], (d_embed,), jnp.float32, -0.1, 0.1),
        "wkv": init_w(ks[2], d_cross, 2 * d_embed),
        "bkv": jax.random.uniform(ks[3], (2 * d_embed,), jnp.float32, -0.1, 0.1),
        "wo": init_w(ks[4], d_embed, d_embed),
        "bo": jax.random.uniform(ks[5], (d_embed,), jnp.float32, -0.1, 0.1),
    }

    query = jax.random.normal(ks[6], (B, Sq, d_embed), jnp.float32)
    keys_n_values = jax.random.normal(ks[7], (B, Skv, d_cross), jnp.float32)

    out = cross_attention_forward(params, query, keys_n_values, n_heads)
    out = jax.block_until_ready(out)

    ref = cross_attention_ref(params, query, keys_n_values, n_heads)
    assert out.shape == (B, Sq, d_embed)
    assert jnp.allclose(out, ref, atol=1e-4, rtol=1e-4), "mismatch vs reference"

    print("KERNEL_OK")
</pallas_src>

<mosaic_0001>
module attributes {stable_mosaic.version = 11 : i64} {
  func.func @_linear_kernel(%arg0: i32, %arg1: i32, %arg2: i32, %arg3: memref<16x32xf32, #tpu.memory_space<vmem>>, %arg4: memref<32x32xf32, #tpu.memory_space<vmem>>, %arg5: memref<1x32xf32, #tpu.memory_space<vmem>>, %arg6: memref<16x32xf32, #tpu.memory_space<vmem>>, %arg7: memref<16x32xf32, #tpu.memory_space<vmem>>) attributes {dimension_semantics = [#tpu.dimension_semantics<parallel>, #tpu.dimension_semantics<parallel>, #tpu.dimension_semantics<arbitrary>], iteration_bounds = array<i64: 1, 1, 1>, scalar_prefetch = 0 : i64, scratch_operands = 1 : i64, tpu.core_type = #tpu.core_type<tc>, window_params = [{transform_indices = @transform_0, window_bounds = array<i64: 16, 32>}, {transform_indices = @transform_1, window_bounds = array<i64: 32, 32>}, {transform_indices = @transform_2, window_bounds = array<i64: 1, 32>}, {transform_indices = @transform_3, window_bounds = array<i64: 16, 32>}]} {
    %c0_i32 = arith.constant 0 : i32
    %0 = arith.cmpi eq, %arg2, %c0_i32 : i32
    %1 = arith.extui %0 : i1 to i32
    %c0_i32_0 = arith.constant 0 : i32
    %2 = arith.cmpi ne, %1, %c0_i32_0 : i32
    scf.if %2 {
      %cst_10 = arith.constant 0.000000e+00 : f32
      %12 = vector.broadcast %cst_10 : f32 to vector<16x32xf32>
      %c0_11 = arith.constant 0 : index
      %c0_12 = arith.constant 0 : index
      %13 = vector.load %arg7[%c0_11, %c0_12] : memref<16x32xf32, #tpu.memory_space<vmem>>, vector<16x32xf32>
      tpu.vector_store %arg7[%c0_11, %c0_12], %12 {strides = array<i32>} : memref<16x32xf32, #tpu.memory_space<vmem>>, vector<16x32xf32>,
    } else {
    }
    %c0 = arith.constant 0 : index
    %c0_1 = arith.constant 0 : index
    %3 = vector.load %arg7[%c0, %c0_1] : memref<16x32xf32, #tpu.memory_space<vmem>>, vector<16x32xf32>
    %c0_2 = arith.constant 0 : index
    %c0_3 = arith.constant 0 : index
    %4 = vector.load %arg3[%c0_2, %c0_3] : memref<16x32xf32, #tpu.memory_space<vmem>>, vector<16x32xf32>
    %c0_4 = arith.constant 0 : index
    %c0_5 = arith.constant 0 : index
    %5 = vector.load %arg4[%c0_4, %c0_5] : memref<32x32xf32, #tpu.memory_space<vmem>>, vector<32x32xf32>
    %cst = arith.constant dense<0.000000e+00> : vector<16x32xf32>
    %6 = tpu.matmul %4, %5, %cst {dimension_numbers = #tpu.dot_dimension_numbers<[1], [0], [0], [1], [0, 0, 1, 1], [], []>} : vector<16x32xf32>, vector<32x32xf32>, vector<16x32xf32> -> vector<16x32xf32>
    %7 = arith.addf %3, %6 : vector<16x32xf32>
    %c0_6 = arith.constant 0 : index
    %c0_7 = arith.constant 0 : index
    %8 = vector.load %arg7[%c0_6, %c0_7] : memref<16x32xf32, #tpu.memory_space<vmem>>, vector<16x32xf32>
    tpu.vector_store %arg7[%c0_6, %c0_7], %7 {strides = array<i32>} : memref<16x32xf32, #tpu.memory_space<vmem>>, vector<16x32xf32>,
    %c0_i32_8 = arith.constant 0 : i32
    %9 = arith.cmpi eq, %arg2, %c0_i32_8 : i32
    %10 = arith.extui %9 : i1 to i32
    %c0_i32_9 = arith.constant 0 : i32
    %11 = arith.cmpi ne, %10, %c0_i32_9 : i32
    scf.if %11 {
      %c0_10 = arith.constant 0 : index
      %c0_11 = arith.constant 0 : index
      %12 = vector.load %arg7[%c0_10, %c0_11] : memref<16x32xf32, #tpu.memory_space<vmem>>, vector<16x32xf32>
      %c0_12 = arith.constant 0 : index
      %c0_13 = arith.constant 0 : index
      %13 = vector.load %arg5[%c0_12, %c0_13] : memref<1x32xf32, #tpu.memory_space<vmem>>, vector<1x32xf32>
      %14 = vector.broadcast %13 : vector<1x32xf32> to vector<16x32xf32>
      %15 = arith.addf %12, %14 : vector<16x32xf32>
      %c0_14 = arith.constant 0 : index
      %c0_15 = arith.constant 0 : index
      %16 = vector.load %arg6[%c0_14, %c0_15] : memref<16x32xf32, #tpu.memory_space<vmem>>, vector<16x32xf32>
      tpu.vector_store %arg6[%c0_14, %c0_15], %15 {strides = array<i32>} : memref<16x32xf32, #tpu.memory_space<vmem>>, vector<16x32xf32>,
    } else {
    }
    return
  }
  func.func @transform_0(%arg0: i32, %arg1: i32, %arg2: i32) -> (i32, i32) {
    %c0_i32 = arith.constant 0 : i32
    return %arg0, %arg2 : i32, i32
  }
  func.func @transform_1(%arg0: i32, %arg1: i32, %arg2: i32) -> (i32, i32) {
    %c0_i32 = arith.constant 0 : i32
    return %arg2, %arg1 : i32, i32
  }
  func.func @transform_2(%arg0: i32, %arg1: i32, %arg2: i32) -> (i32, i32) {
    %c0_i32 = arith.constant 0 : i32
    %c0_i32_0 = arith.constant 0 : i32
    return %c0_i32, %arg1 : i32, i32
  }
  func.func @transform_3(%arg0: i32, %arg1: i32, %arg2: i32) -> (i32, i32) {
    %c0_i32 = arith.constant 0 : i32
    return %arg0, %arg1 : i32, i32
  }
}

</mosaic_0001>

<bundles_post_ra>
// kernel: tpu_custom_call.1
= control target key start
LH: loop header
LB: loop body
LE: loop exit
PB: predicated region body
PF: predicated region fallthrough
CT: control target
= control target key end

     0   :  { %8 = vsyncpa [#allocation4], 0  ;;  %s325_s0 = inlined_call_operand.hbm [shape: f32[16,32], index: 0, kind: input, shape index: {}]   ;;  %s326_s1 = inlined_call_operand.hbm [shape: f32[32,32], index: 1, kind: input, shape index: {}]   ;;  %s327_s2 = inlined_call_operand.vmem [shape: f32[1,32], index: 2, kind: input, shape index: {}]   ;;  %s328_s3 = inlined_call_operand.hbm [shape: f32[16,32], index: 3, kind: output, shape index: {}]  }
   0x1   :  { %9 = vsyncpa [#allocation7], 0 }
   0x2   :  { %10 = vsyncpa [#allocation5], 0  ;;  %s270_s12 = smov [#allocation3]  }
   0x3   :  { %s16_s13 = sshll.u32 %s270_s12, 4  ;;  %s17_s13 = int_to_ptr.vmem [resolvable:$true] %s16_s13 }
   0x4   :  { %s212_s14 = scalar_lea.vmem %s17_s13, 256  ;;  %p217_p1 = scmp.lt.s32.totalorder %s17_s13, %s17_s13 }
   0x5   :  { %p213_p0 = scmp.ne.s32.totalorder %s17_s13, %s212_s14  ;;  %p218_p2 = scmp.lt.s32.totalorder %s212_s14, %s212_s14 }
   0x7   :  { %p219_p3 = por %p218_p2, %p217_p1 }
   0x9   :  { %p220_p4 = pnand %p219_p3, %p213_p0 }
   0xb   :  { %223 = shalt.err (!%p220_p4)
}
   0xc   :  { %s271_s15 = smov 128   ;;  %s272_s16 = smov 8  }
   0xd   :  { %22 = dma.hbm_to_vmem [thread:$0]  %s325_s0, 256, %s17_s13, [#allocation4], %s271_s15, %s271_s15, %s272_s16  }
   0xe   :  { %s273_s19 = smov [#allocation6]  }
   0xf   :  { %s28_s20 = sshll.u32 %s273_s19, 4  ;;  %s29_s20 = int_to_ptr.vmem [resolvable:$true] %s28_s20 }
  0x10   :  { %s232_s21 = scalar_lea.vmem %s29_s20, 512  ;;  %p237_p6 = scmp.lt.s32.totalorder %s29_s20, %s29_s20 }
  0x11   :  { %p233_p5 = scmp.ne.s32.totalorder %s29_s20, %s232_s21  ;;  %p238_p7 = scmp.lt.s32.totalorder %s232_s21, %s232_s21 }
  0x13   :  { %p239_p8 = por %p238_p7, %p237_p6 }
  0x15   :  { %p240_p9 = pnand %p239_p8, %p233_p5 }
  0x17   :  { %243 = shalt.err (!%p240_p9)
}
  0x18   :  { %34 = dma.hbm_to_vmem [thread:$0]  %s326_s1, 512, %s29_s20, [#allocation7], %s271_s15, %s271_s15, %s272_s16  }
  0x19   :  { %264 = dma.done.wait [#allocation4], 256  }
  0x1a   :  { %265 = vsyncadd [#allocation4], 4294967040 }
  0x1b   :  { %266 = dma.done.wait [#allocation7], 512  }
  0x1c   :  { %267 = vsyncadd [#allocation7], 4294966784  ;;  %vm47_vm0 = vcmask 261120   ;;  %v274_v0 = vmov 0.0   ;;  %v57_v1 = vld [vmem:[#allocation6 + $0x18] sm:$0xff]  ;;  %v56_v2 = vld [vmem:[#allocation6 + $0x10] sm:$0xff] }
  0x1d   :  { %49 = vst.msk [vmem:[#allocation2 + $0x8] sm:$0xff] %vm47_vm0, %v274_v0  ;;  %48 = vst.msk [vmem:[#allocation2] sm:$0xff] %vm47_vm0, %v274_v0  ;;  %187 = vmatprep.subr.mxu0 %v57_v1  ;;  %v52_v3 = vld [vmem:[#allocation3] sm:$0xff]  ;;  %v55_v4 = vld [vmem:[#allocation6 + $0x8] sm:$0xff]  ;;  %s275_s24 = smov [#allocation8]  }
  0x1e   :  { %188 = vmatpush3.msra.mxu0 %v57_v1  ;;  %195 = vmatprep.mubr.msk.f32.mxu0 %vm47_vm0, %v52_v3  ;;  %v54_v5 = vld [vmem:[#allocation6] sm:$0xff]  ;;  %v53_v6 = vld [vmem:[#allocation3 + $0x8] sm:$0xff]  ;;  %s165_s25 = sshll.u32 %s275_s24, 4  ;;  %s166_s25 = int_to_ptr.vmem [resolvable:$true] %s165_s25 }
  0x1f   :  { %189 = vmatprep.subr.mxu0 %v56_v2  ;;  %v180_v13 = vld [vmem:[%s327_s2] ss:$0 sm:$0xff]  ;;  %s244_s26 = scalar_lea.vmem %s166_s25, 256  ;;  %p249_p11 = scmp.lt.s32.totalorder %s166_s25, %s166_s25 }
  0x20   :  { %190 = vmatpush3.msra.mxu0 %v56_v2  ;;  %p245_p10 = scmp.ne.s32.totalorder %s166_s25, %s244_s26  ;;  %p250_p12 = scmp.lt.s32.totalorder %s244_s26, %s244_s26 }
  0x21   :  { %191 = vmatprep.subr.mxu0 %v55_v4 }
  0x22   :  { %192 = vmatpush3.msra.mxu0 %v55_v4  ;;  %p251_p13 = por %p250_p12, %p249_p11 }
  0x23   :  { %193 = vmatprep.subr.mxu0 %v54_v5 }
  0x24   :  { %194 = vmatpush3.msra.mxu0 %v54_v5  ;;  %v51_v7 = vld [vmem:[#allocation2 + $0x8] sm:$0xff]  ;;  %v50_v9 = vld [vmem:[#allocation2] sm:$0xff]  ;;  %p252_p0 = pnand %p251_p13, %p245_p10 }
  0x25   :  { %196 = vmatmul.mubr.msk.f32.vlgmr.msra.gmra.mxu0 %vm47_vm0, %v53_v6 }
  0xe5   :  { %v197_v8 = vpop.f32.mrf.mxu0 }
  0xe6   :  { %v141_v10 = vadd.f32 %v197_v8, %v51_v7 }
  0xe7   :  { %v131_v11 = vpop.f32.mrf.mxu0 }
  0xe8   :  { %143 = vst.msk [vmem:[#allocation2 + $0x8] sm:$0xff] %vm47_vm0, %v141_v10  ;;  %v140_v12 = vadd.f32 %v131_v11, %v50_v9 }
  0xea   :  { %142 = vst.msk [vmem:[#allocation2] sm:$0xff] %vm47_vm0, %v140_v12 }
  0xef   :  { %v148_v14 = vld [vmem:[#allocation2 + $0x8] sm:$0xff] }
  0xf0   :  { %v157_v15 = vadd.f32 %v180_v13, %v148_v14 }
  0xf1   :  { %v147_v16 = vld [vmem:[#allocation2] sm:$0xff] }
  0xf2   :  { %v156_v17 = vadd.f32 %v180_v13, %v147_v16  ;;  %159 = vst.msk [vmem:[#allocation8 + $0x8] sm:$0xff] %vm47_vm0, %v157_v15 }
  0xf4   :  { %158 = vst.msk [vmem:[#allocation8] sm:$0xff] %vm47_vm0, %v156_v17 }
  0xf5   :  { %255 = shalt.err (!%p252_p0)
}
  0xf6   :  { %171 = dma.vmem_to_hbm [thread:$0]  %s166_s25, 256, %s328_s3, [#allocation5], %s271_s15, %s271_s15, %s272_s16  }
  0xf7   :  { %268 = dma.done.wait [#allocation5], 256  }
  0xf8   :  { %269 = vsyncadd [#allocation5], 4294967040 }
  0xf9   :  { %175 = vsyncpa [#allocation4], 1 }
  0xfa   :  { %176 = vsyncpa [#allocation7], 1 }
  0xfb   :  { %177 = vsyncpa [#allocation5], 1 }

</bundles_post_ra>
